<compile_context>
chip_gen: v5e
topology: v5e:2x2
jax: 0.10.0
libtpu: 0.0.40
codegen_flags: <defaults>
</compile_context>

<pallas_src>
import jax
import jax.numpy as jnp
import numpy as np
from jax.experimental import pallas as pl
from jax.experimental.pallas import tpu as pltpu


def _round_up(n, m):
    return ((n + m - 1) // m) * m


# --------------------------------------------------------------------------- #
# Kernels
# --------------------------------------------------------------------------- #
def _pointnet_backbone_kernel(
    x_ref,                                    # (TN, 3)    f32  one point tile
    w1_ref,                                   # (3, 64)    f32  BN scale folded
    w2_ref, w3_ref, w4_ref, w5_ref,           # bf16, BN scale folded (w5 lane-padded)
    b1_ref, b2_ref, b3_ref, b4_ref, b5_ref,   # (1, C)     f32  folded BN shifts
    y_ref,                                    # (1, E_pad) f32  max-pool accumulator / output
):
    t = pl.program_id(1)

    # ReLU outputs are >= 0, so 0 is a valid identity for the running max.
    @pl.when(t == 0)
    def _():
        y_ref[...] = jnp.zeros_like(y_ref)

    x = x_ref[...]                                            # (TN, 3) f32
    w1 = w1_ref[...]
    # conv1 (cin=3): three broadcast FMAs on the VPU (kept f32: no bf16 VALU on v5e).
    h = (x[:, 0:1] * w1[0:1, :]
         + x[:, 1:2] * w1[1:2, :]
         + x[:, 2:3] * w1[2:3, :])
    h = jnp.maximum(h + b1_ref[...], 0.0).astype(jnp.bfloat16)   # (TN, 64)

    def conv_bn_relu(h_bf16, w_ref, b_ref):
        # bf16 MXU matmul with f32 accumulation; bias/ReLU epilogue in f32.
        acc = jnp.dot(h_bf16, w_ref[...], preferred_element_type=jnp.float32)
        return jnp.maximum(acc + b_ref[...], 0.0)

    h = conv_bn_relu(h, w2_ref, b2_ref).astype(jnp.bfloat16)     # (TN, 64)
    h = conv_bn_relu(h, w3_ref, b3_ref).astype(jnp.bfloat16)     # (TN, 64)
    h = conv_bn_relu(h, w4_ref, b4_ref).astype(jnp.bfloat16)     # (TN, 128)
    h5 = conv_bn_relu(h, w5_ref, b5_ref)                         # (TN, E_pad) f32

    # Online adaptive_max_pool1d: one sublane reduce per tile + running max.
    y_ref[...] = jnp.maximum(y_ref[...], jnp.max(h5, axis=0, keepdims=True))


def _projector_kernel(y_ref, wp1_ref, bp_ref, wp2_ref, z_ref):
    # Linear(no bias) -> folded BN -> ReLU -> Linear(no bias), whole batch at once.
    p = jnp.dot(y_ref[...].astype(jnp.bfloat16), wp1_ref[...],
                preferred_element_type=jnp.float32)
    p = jnp.maximum(p + bp_ref[...], 0.0)
    z_ref[...] = jnp.dot(p.astype(jnp.bfloat16), wp2_ref[...],
                         preferred_element_type=jnp.float32)


# --------------------------------------------------------------------------- #
# Parameter construction / folding (wrapper-side, one-time)
# --------------------------------------------------------------------------- #
def make_params(key, emb_dims, mlp_hidden, proj_size):
    """Deterministic synthetic parameters (shapes match the nn.Module)."""
    dims = [(3, 64), (64, 64), (64, 64), (64, 128), (128, emb_dims)]
    keys = jax.random.split(key, 8)
    p = {}
    for i, (cin, cout) in enumerate(dims):
        # torch conv weight is (cout, cin, 1); stored here as (cin, cout).
        p[f"conv{i+1}_w"] = jax.random.normal(keys[i], (cin, cout), jnp.float32) * 0.1
        r = jnp.arange(cout, dtype=jnp.float32)
        p[f"bn{i+1}"] = dict(
            gamma=1.0 + 0.05 * r / cout,
            beta=0.01 * r,
            mean=0.02 * jnp.sin(r),
            var=1.0 + 0.1 * jnp.cos(r) ** 2,
        )
    p["proj_w1"] = jax.random.normal(keys[5], (emb_dims, mlp_hidden), jnp.float32) * 0.1
    r = jnp.arange(mlp_hidden, dtype=jnp.float32)
    p["proj_bn"] = dict(
        gamma=1.0 + 0.03 * r / mlp_hidden,
        beta=0.02 * r,
        mean=0.01 * jnp.cos(r),
        var=1.0 + 0.05 * jnp.sin(r) ** 2,
    )
    p["proj_w2"] = jax.random.normal(keys[6], (mlp_hidden, proj_size), jnp.float32) * 0.1
    return p


def fold_and_pack_params(raw, emb_dims, mlp_hidden, proj_size, eps=1e-5):
    """Fold eval-mode BN into weights, pad output dims to 128 lanes, cast bf16."""
    E_pad = max(128, _round_up(emb_dims, 128))
    P_pad = max(128, _round_up(proj_size, 128))
    prep = {}
    for i in range(1, 6):
        bn = raw[f"bn{i}"]
        s = bn["gamma"] / jnp.sqrt(bn["var"] + eps)
        shift = bn["beta"] - bn["mean"] * s
        w = raw[f"conv{i}_w"] * s[None, :]          # fold BN scale into weight
        b = shift[None, :]
        if i == 5:
            # Zero-padded columns/bias => padded lanes of h5 are exactly 0 after ReLU.
            w = jnp.pad(w, ((0, 0), (0, E_pad - emb_dims)))
            b = jnp.pad(b, ((0, 0), (0, E_pad - emb_dims)))
        if i == 1:
            prep["w1"] = w.astype(jnp.float32)      # VPU FMA path stays f32
        else:
            prep[f"w{i}"] = w.astype(jnp.bfloat16)
        prep[f"b{i}"] = b.astype(jnp.float32)

    bn = raw["proj_bn"]
    sp = bn["gamma"] / jnp.sqrt(bn["var"] + eps)
    shiftp = bn["beta"] - bn["mean"] * sp
    wp1 = raw["proj_w1"] * sp[None, :]
    wp1 = jnp.pad(wp1, ((0, E_pad - emb_dims), (0, 0)))   # zero rows for padded y lanes
    prep["wp1"] = wp1.astype(jnp.bfloat16)
    prep["bp"] = shiftp[None, :].astype(jnp.float32)
    wp2 = jnp.pad(raw["proj_w2"], ((0, 0), (0, P_pad - proj_size)))
    prep["wp2"] = wp2.astype(jnp.bfloat16)
    return prep


# --------------------------------------------------------------------------- #
# Wrapper
# --------------------------------------------------------------------------- #
def target_network_pointnet(x_ncw, prep, emb_dims, proj_size, *, tile_n=2048):
    """x_ncw: (B, 3, N) as in PyTorch.  Returns (y, z)."""
    B, C, N = x_ncw.shape
    assert C == 3
    E_pad = prep["w5"].shape[1]
    P_pad = prep["wp2"].shape[1]
    H = prep["wp1"].shape[1]

    TN = min(tile_n, _round_up(N, 8))
    N_pad = _round_up(N, TN)
    num_tiles = N_pad // TN

    # NCW -> (B, N, 3); pad the point axis by edge replication (max-pool safe).
    x = jnp.transpose(x_ncw, (0, 2, 1)).astype(jnp.float32)
    if N_pad != N:
        x = jnp.pad(x, ((0, 0), (0, N_pad - N), (0, 0)), mode="edge")

    weight_keys = ["w1", "w2", "w3", "w4", "w5", "b1", "b2", "b3", "b4", "b5"]
    weights = [prep[k] for k in weight_keys]

    def const_spec(a):
        zeros = (0,) * a.ndim
        return pl.BlockSpec(a.shape, lambda b, t, _z=zeros: _z)

    bb_flops = int(2 * B * N_pad * (3 * 64 + 64 * 64 + 64 * 64 + 64 * 128 + 128 * E_pad))
    bb_bytes = int(x.size * 4
                   + sum(int(w.size) * w.dtype.itemsize for w in weights)
                   + B * E_pad * 4)

    y3 = pl.pallas_call(
        _pointnet_backbone_kernel,
        out_shape=jax.ShapeDtypeStruct((B, 1, E_pad), jnp.float32),
        grid=(B, num_tiles),
        in_specs=[pl.BlockSpec((None, TN, 3), lambda b, t: (b, t, 0))]
                 + [const_spec(w) for w in weights],
        out_specs=pl.BlockSpec((None, 1, E_pad), lambda b, t: (b, 0, 0)),
        compiler_params=pltpu.CompilerParams(
            dimension_semantics=("parallel", "arbitrary"),
            vmem_limit_bytes=40 * 1024 * 1024),
        cost_estimate=pl.CostEstimate(
            flops=bb_flops, transcendentals=0, bytes_accessed=bb_bytes),
    )(x, *weights)

    y_pad = y3[:, 0, :]                                       # (B, E_pad)

    # Projector as a separate tiny call: keeps wp1/wp2 out of the per-tile
    # pipeline and runs one batch-wide matmul chain.
    pj_flops = int(2 * B * (E_pad * H + H * P_pad))
    pj_bytes = int(B * E_pad * 4 + int(prep["wp1"].size) * 2 + int(prep["bp"].size) * 4
                   + int(prep["wp2"].size) * 2 + B * P_pad * 4)
    z_pad = pl.pallas_call(
        _projector_kernel,
        out_shape=jax.ShapeDtypeStruct((B, P_pad), jnp.float32),
        cost_estimate=pl.CostEstimate(
            flops=pj_flops, transcendentals=0, bytes_accessed=pj_bytes),
    )(y_pad, prep["wp1"], prep["bp"], prep["wp2"])

    return y_pad[:, :emb_dims], z_pad[:, :proj_size]


# --------------------------------------------------------------------------- #
# Pure-JAX reference (same folded params, same bf16 activation storage)
# --------------------------------------------------------------------------- #
def _reference(x_ncw, prep, emb_dims, proj_size):
    x = jnp.transpose(x_ncw, (0, 2, 1)).astype(jnp.float32)   # (B, N, 3)
    w1 = prep["w1"]
    h = (x[..., 0:1] * w1[0, :] + x[..., 1:2] * w1[1, :] + x[..., 2:3] * w1[2, :])
    h = jnp.maximum(h + prep["b1"], 0.0).astype(jnp.bfloat16)
    for i in range(2, 6):
        acc = jnp.einsum("bnc,cd->bnd", h, prep[f"w{i}"],
                         preferred_element_type=jnp.float32)
        hf = jnp.maximum(acc + prep[f"b{i}"], 0.0)
        h = hf.astype(jnp.bfloat16) if i < 5 else hf
    y = jnp.max(h, axis=1)                                    # (B, E_pad) f32
    p = jnp.dot(y.astype(jnp.bfloat16), prep["wp1"],
                preferred_element_type=jnp.float32)
    p = jnp.maximum(p + prep["bp"], 0.0)
    z = jnp.dot(p.astype(jnp.bfloat16), prep["wp2"],
                preferred_element_type=jnp.float32)
    return y[:, :emb_dims], z[:, :proj_size]


# --------------------------------------------------------------------------- #
if __name__ == "__main__":
    # hparams implied by the module (kept small)
    emb_dims = 32
    mlp_hidden_size = 32
    projection_size = 16
    B, N = 2, 16

    key = jax.random.PRNGKey(0)
    kx, kp = jax.random.split(key)
    x = jax.random.normal(kx, (B, 3, N), jnp.float32)          # PyTorch NCW input
    raw = make_params(kp, emb_dims, mlp_hidden_size, projection_size)
    prep = fold_and_pack_params(raw, emb_dims, mlp_hidden_size, projection_size)

    # tile_n=8 => two point tiles per sample: exercises the accumulator path.
    y, z = target_network_pointnet(x, prep, emb_dims, projection_size, tile_n=8)
    y, z = jax.block_until_ready(y), jax.block_until_ready(z)

    y_ref, z_ref = _reference(x, prep, emb_dims, projection_size)
    assert y.shape == (B, emb_dims) and z.shape == (B, projection_size)
    np.testing.assert_allclose(np.asarray(y), np.asarray(y_ref), rtol=1e-2, atol=1e-2)
    np.testing.assert_allclose(np.asarray(z), np.asarray(z_ref), rtol=1e-2, atol=1e-2)

    print("KERNEL_OK")
</pallas_src>

<mosaic_0001>
module attributes {stable_mosaic.version = 11 : i64} {
  func.func @_pointnet_backbone_kernel(%arg0: i32, %arg1: i32, %arg2: memref<1x8x3xf32, #tpu.memory_space<vmem>>, %arg3: memref<3x64xf32, #tpu.memory_space<vmem>>, %arg4: memref<64x64xbf16, #tpu.memory_space<vmem>>, %arg5: memref<64x64xbf16, #tpu.memory_space<vmem>>, %arg6: memref<64x128xbf16, #tpu.memory_space<vmem>>, %arg7: memref<128x128xbf16, #tpu.memory_space<vmem>>, %arg8: memref<1x64xf32, #tpu.memory_space<vmem>>, %arg9: memref<1x64xf32, #tpu.memory_space<vmem>>, %arg10: memref<1x64xf32, #tpu.memory_space<vmem>>, %arg11: memref<1x128xf32, #tpu.memory_space<vmem>>, %arg12: memref<1x128xf32, #tpu.memory_space<vmem>>, %arg13: memref<1x1x128xf32, #tpu.memory_space<vmem>>) attributes {dimension_semantics = [#tpu.dimension_semantics<parallel>, #tpu.dimension_semantics<arbitrary>], iteration_bounds = array<i64: 2, 2>, scalar_prefetch = 0 : i64, scratch_operands = 0 : i64, tpu.core_type = #tpu.core_type<tc>, window_params = [{transform_indices = @transform_0, window_bounds = array<i64: 1, 8, 3>}, {pipeline_mode = #tpu.pipeline_mode<synchronous>, transform_indices = @transform_1, window_bounds = array<i64: 3, 64>}, {pipeline_mode = #tpu.pipeline_mode<synchronous>, transform_indices = @transform_2, window_bounds = array<i64: 64, 64>}, {pipeline_mode = #tpu.pipeline_mode<synchronous>, transform_indices = @transform_3, window_bounds = array<i64: 64, 64>}, {pipeline_mode = #tpu.pipeline_mode<synchronous>, transform_indices = @transform_4, window_bounds = array<i64: 64, 128>}, {pipeline_mode = #tpu.pipeline_mode<synchronous>, transform_indices = @transform_5, window_bounds = array<i64: 128, 128>}, {pipeline_mode = #tpu.pipeline_mode<synchronous>, transform_indices = @transform_6, window_bounds = array<i64: 1, 64>}, {pipeline_mode = #tpu.pipeline_mode<synchronous>, transform_indices = @transform_7, window_bounds = array<i64: 1, 64>}, {pipeline_mode = #tpu.pipeline_mode<synchronous>, transform_indices = @transform_8, window_bounds = array<i64: 1, 64>}, {pipeline_mode = #tpu.pipeline_mode<synchronous>, transform_indices = @transform_9, window_bounds = array<i64: 1, 128>}, {pipeline_mode = #tpu.pipeline_mode<synchronous>, transform_indices = @transform_10, window_bounds = array<i64: 1, 128>}, {transform_indices = @transform_11, window_bounds = array<i64: 1, 1, 128>}]} {
    %c0_i32 = arith.constant 0 : i32
    %0 = arith.cmpi eq, %arg1, %c0_i32 : i32
    %1 = arith.extui %0 : i1 to i32
    %c0_i32_0 = arith.constant 0 : i32
    %2 = arith.cmpi ne, %1, %c0_i32_0 : i32
    scf.if %2 {
      %cst_38 = arith.constant 0.000000e+00 : f32
      %68 = vector.broadcast %cst_38 : f32 to vector<1x128xf32>
      %c0_39 = arith.constant 0 : index
      %c0_40 = arith.constant 0 : index
      %c0_41 = arith.constant 0 : index
      %69 = vector.load %arg13[%c0_39, %c0_40, %c0_41] : memref<1x1x128xf32, #tpu.memory_space<vmem>>, vector<1x1x128xf32>
      %70 = vector.shape_cast %69 : vector<1x1x128xf32> to vector<1x128xf32>
      %71 = vector.shape_cast %68 : vector<1x128xf32> to vector<1x1x128xf32>
      tpu.vector_store %arg13[%c0_39, %c0_40, %c0_41], %71 {strides = array<i32>} : memref<1x1x128xf32, #tpu.memory_space<vmem>>, vector<1x1x128xf32>,
    } else {
    }
    %c0 = arith.constant 0 : index
    %c0_1 = arith.constant 0 : index
    %c0_2 = arith.constant 0 : index
    %3 = vector.load %arg2[%c0, %c0_1, %c0_2] : memref<1x8x3xf32, #tpu.memory_space<vmem>>, vector<1x8x3xf32>
    %4 = vector.shape_cast %3 : vector<1x8x3xf32> to vector<8x3xf32>
    %c0_3 = arith.constant 0 : index
    %c0_4 = arith.constant 0 : index
    %5 = vector.load %arg3[%c0_3, %c0_4] : memref<3x64xf32, #tpu.memory_space<vmem>>, vector<3x64xf32>
    %6 = vector.extract_strided_slice %4 {offsets = [0, 0], sizes = [8, 1], strides = [1, 1]} : vector<8x3xf32> to vector<8x1xf32>
    %7 = vector.extract_strided_slice %5 {offsets = [0, 0], sizes = [1, 64], strides = [1, 1]} : vector<3x64xf32> to vector<1x64xf32>
    %8 = vector.broadcast %6 : vector<8x1xf32> to vector<8x64xf32>
    %9 = vector.broadcast %7 : vector<1x64xf32> to vector<8x64xf32>
    %10 = arith.mulf %8, %9 : vector<8x64xf32>
    %11 = vector.extract_strided_slice %4 {offsets = [0, 1], sizes = [8, 1], strides = [1, 1]} : vector<8x3xf32> to vector<8x1xf32>
    %12 = vector.extract_strided_slice %5 {offsets = [1, 0], sizes = [1, 64], strides = [1, 1]} : vector<3x64xf32> to vector<1x64xf32>
    %13 = vector.broadcast %11 : vector<8x1xf32> to vector<8x64xf32>
    %14 = vector.broadcast %12 : vector<1x64xf32> to vector<8x64xf32>
    %15 = arith.mulf %13, %14 : vector<8x64xf32>
    %16 = arith.addf %10, %15 : vector<8x64xf32>
    %17 = vector.extract_strided_slice %4 {offsets = [0, 2], sizes = [8, 1], strides = [1, 1]} : vector<8x3xf32> to vector<8x1xf32>
    %18 = vector.extract_strided_slice %5 {offsets = [2, 0], sizes = [1, 64], strides = [1, 1]} : vector<3x64xf32> to vector<1x64xf32>
    %19 = vector.broadcast %17 : vector<8x1xf32> to vector<8x64xf32>
    %20 = vector.broadcast %18 : vector<1x64xf32> to vector<8x64xf32>
    %21 = arith.mulf %19, %20 : vector<8x64xf32>
    %22 = arith.addf %16, %21 : vector<8x64xf32>
    %c0_5 = arith.constant 0 : index
    %c0_6 = arith.constant 0 : index
    %23 = vector.load %arg8[%c0_5, %c0_6] : memref<1x64xf32, #tpu.memory_space<vmem>>, vector<1x64xf32>
    %24 = vector.broadcast %23 : vector<1x64xf32> to vector<8x64xf32>
    %25 = arith.addf %22, %24 : vector<8x64xf32>
    %cst = arith.constant 0.000000e+00 : f32
    %26 = vector.broadcast %cst : f32 to vector<8x64xf32>
    %27 = arith.maximumf %25, %26 : vector<8x64xf32>
    %28 = arith.truncf %27 : vector<8x64xf32> to vector<8x64xbf16>
    %c0_7 = arith.constant 0 : index
    %c0_8 = arith.constant 0 : index
    %29 = vector.load %arg4[%c0_7, %c0_8] : memref<64x64xbf16, #tpu.memory_space<vmem>>, vector<64x64xbf16>
    %cst_9 = arith.constant dense<0.000000e+00> : vector<8x64xf32>
    %30 = tpu.matmul %28, %29, %cst_9 {dimension_numbers = #tpu.dot_dimension_numbers<[1], [0], [0], [1], [0, 0, 1, 1], [], []>} : vector<8x64xbf16>, vector<64x64xbf16>, vector<8x64xf32> -> vector<8x64xf32>
    %c0_10 = arith.constant 0 : index
    %c0_11 = arith.constant 0 : index
    %31 = vector.load %arg9[%c0_10, %c0_11] : memref<1x64xf32, #tpu.memory_space<vmem>>, vector<1x64xf32>
    %32 = vector.broadcast %31 : vector<1x64xf32> to vector<8x64xf32>
    %33 = arith.addf %30, %32 : vector<8x64xf32>
    %cst_12 = arith.constant 0.000000e+00 : f32
    %34 = vector.broadcast %cst_12 : f32 to vector<8x64xf32>
    %35 = arith.maximumf %33, %34 : vector<8x64xf32>
    %36 = arith.truncf %35 : vector<8x64xf32> to vector<8x64xbf16>
    %c0_13 = arith.constant 0 : index
    %c0_14 = arith.constant 0 : index
    %37 = vector.load %arg5[%c0_13, %c0_14] : memref<64x64xbf16, #tpu.memory_space<vmem>>, vector<64x64xbf16>
    %cst_15 = arith.constant dense<0.000000e+00> : vector<8x64xf32>
    %38 = tpu.matmul %36, %37, %cst_15 {dimension_numbers = #tpu.dot_dimension_numbers<[1], [0], [0], [1], [0, 0, 1, 1], [], []>} : vector<8x64xbf16>, vector<64x64xbf16>, vector<8x64xf32> -> vector<8x64xf32>
    %c0_16 = arith.constant 0 : index
    %c0_17 = arith.constant 0 : index
    %39 = vector.load %arg10[%c0_16, %c0_17] : memref<1x64xf32, #tpu.memory_space<vmem>>, vector<1x64xf32>
    %40 = vector.broadcast %39 : vector<1x64xf32> to vector<8x64xf32>
    %41 = arith.addf %38, %40 : vector<8x64xf32>
    %cst_18 = arith.constant 0.000000e+00 : f32
    %42 = vector.broadcast %cst_18 : f32 to vector<8x64xf32>
    %43 = arith.maximumf %41, %42 : vector<8x64xf32>
    %44 = arith.truncf %43 : vector<8x64xf32> to vector<8x64xbf16>
    %c0_19 = arith.constant 0 : index
    %c0_20 = arith.constant 0 : index
    %45 = vector.load %arg6[%c0_19, %c0_20] : memref<64x128xbf16, #tpu.memory_space<vmem>>, vector<64x128xbf16>
    %cst_21 = arith.constant dense<0.000000e+00> : vector<8x128xf32>
    %46 = tpu.matmul %44, %45, %cst_21 {dimension_numbers = #tpu.dot_dimension_numbers<[1], [0], [0], [1], [0, 0, 1, 1], [], []>} : vector<8x64xbf16>, vector<64x128xbf16>, vector<8x128xf32> -> vector<8x128xf32>
    %c0_22 = arith.constant 0 : index
    %c0_23 = arith.constant 0 : index
    %47 = vector.load %arg11[%c0_22, %c0_23] : memref<1x128xf32, #tpu.memory_space<vmem>>, vector<1x128xf32>
    %48 = vector.broadcast %47 : vector<1x128xf32> to vector<8x128xf32>
    %49 = arith.addf %46, %48 : vector<8x128xf32>
    %cst_24 = arith.constant 0.000000e+00 : f32
    %50 = vector.broadcast %cst_24 : f32 to vector<8x128xf32>
    %51 = arith.maximumf %49, %50 : vector<8x128xf32>
    %52 = arith.truncf %51 : vector<8x128xf32> to vector<8x128xbf16>
    %c0_25 = arith.constant 0 : index
    %c0_26 = arith.constant 0 : index
    %53 = vector.load %arg7[%c0_25, %c0_26] : memref<128x128xbf16, #tpu.memory_space<vmem>>, vector<128x128xbf16>
    %cst_27 = arith.constant dense<0.000000e+00> : vector<8x128xf32>
    %54 = tpu.matmul %52, %53, %cst_27 {dimension_numbers = #tpu.dot_dimension_numbers<[1], [0], [0], [1], [0, 0, 1, 1], [], []>} : vector<8x128xbf16>, vector<128x128xbf16>, vector<8x128xf32> -> vector<8x128xf32>
    %c0_28 = arith.constant 0 : index
    %c0_29 = arith.constant 0 : index
    %55 = vector.load %arg12[%c0_28, %c0_29] : memref<1x128xf32, #tpu.memory_space<vmem>>, vector<1x128xf32>
    %56 = vector.broadcast %55 : vector<1x128xf32> to vector<8x128xf32>
    %57 = arith.addf %54, %56 : vector<8x128xf32>
    %cst_30 = arith.constant 0.000000e+00 : f32
    %58 = vector.broadcast %cst_30 : f32 to vector<8x128xf32>
    %59 = arith.maximumf %57, %58 : vector<8x128xf32>
    %c0_31 = arith.constant 0 : index
    %c0_32 = arith.constant 0 : index
    %c0_33 = arith.constant 0 : index
    %60 = vector.load %arg13[%c0_31, %c0_32, %c0_33] : memref<1x1x128xf32, #tpu.memory_space<vmem>>, vector<1x1x128xf32>
    %61 = vector.shape_cast %60 : vector<1x1x128xf32> to vector<1x128xf32>
    %cst_34 = arith.constant dense<0xFF800000> : vector<128xf32>
    %62 = vector.multi_reduction <maximumf>, %59, %cst_34 [0] : vector<8x128xf32> to vector<128xf32>
    %63 = vector.shape_cast %62 : vector<128xf32> to vector<1x128xf32>
    %64 = arith.maximumf %61, %63 : vector<1x128xf32>
    %c0_35 = arith.constant 0 : index
    %c0_36 = arith.constant 0 : index
    %c0_37 = arith.constant 0 : index
    %65 = vector.load %arg13[%c0_35, %c0_36, %c0_37] : memref<1x1x128xf32, #tpu.memory_space<vmem>>, vector<1x1x128xf32>
    %66 = vector.shape_cast %65 : vector<1x1x128xf32> to vector<1x128xf32>
    %67 = vector.shape_cast %64 : vector<1x128xf32> to vector<1x1x128xf32>
    tpu.vector_store %arg13[%c0_35, %c0_36, %c0_37], %67 {strides = array<i32>} : memref<1x1x128xf32, #tpu.memory_space<vmem>>, vector<1x1x128xf32>,
    return
  }
  func.func @transform_0(%arg0: i32, %arg1: i32) -> (i32, i32, i32) {
    %c0_i32 = arith.constant 0 : i32
    %c0_i32_0 = arith.constant 0 : i32
    return %arg0, %arg1, %c0_i32 : i32, i32, i32
  }
  func.func @transform_1(%arg0: i32, %arg1: i32) -> (i32, i32) {
    %c0_i32 = arith.constant 0 : i32
    %c0_i32_0 = arith.constant 0 : i32
    %c0_i32_1 = arith.constant 0 : i32
    return %c0_i32, %c0_i32_0 : i32, i32
  }
  func.func @transform_2(%arg0: i32, %arg1: i32) -> (i32, i32) {
    %c0_i32 = arith.constant 0 : i32
    %c0_i32_0 = arith.constant 0 : i32
    %c0_i32_1 = arith.constant 0 : i32
    return %c0_i32, %c0_i32_0 : i32, i32
  }
  func.func @transform_3(%arg0: i32, %arg1: i32) -> (i32, i32) {
    %c0_i32 = arith.constant 0 : i32
    %c0_i32_0 = arith.constant 0 : i32
    %c0_i32_1 = arith.constant 0 : i32
    return %c0_i32, %c0_i32_0 : i32, i32
  }
  func.func @transform_4(%arg0: i32, %arg1: i32) -> (i32, i32) {
    %c0_i32 = arith.constant 0 : i32
    %c0_i32_0 = arith.constant 0 : i32
    %c0_i32_1 = arith.constant 0 : i32
    return %c0_i32, %c0_i32_0 : i32, i32
  }
  func.func @transform_5(%arg0: i32, %arg1: i32) -> (i32, i32) {
    %c0_i32 = arith.constant 0 : i32
    %c0_i32_0 = arith.constant 0 : i32
    %c0_i32_1 = arith.constant 0 : i32
    return %c0_i32, %c0_i32_0 : i32, i32
  }
  func.func @transform_6(%arg0: i32, %arg1: i32) -> (i32, i32) {
    %c0_i32 = arith.constant 0 : i32
    %c0_i32_0 = arith.constant 0 : i32
    %c0_i32_1 = arith.constant 0 : i32
    return %c0_i32, %c0_i32_0 : i32, i32
  }
  func.func @transform_7(%arg0: i32, %arg1: i32) -> (i32, i32) {
    %c0_i32 = arith.constant 0 : i32
    %c0_i32_0 = arith.constant 0 : i32
    %c0_i32_1 = arith.constant 0 : i32
    return %c0_i32, %c0_i32_0 : i32, i32
  }
  func.func @transform_8(%arg0: i32, %arg1: i32) -> (i32, i32) {
    %c0_i32 = arith.constant 0 : i32
    %c0_i32_0 = arith.constant 0 : i32
    %c0_i32_1 = arith.constant 0 : i32
    return %c0_i32, %c0_i32_0 : i32, i32
  }
  func.func @transform_9(%arg0: i32, %arg1: i32) -> (i32, i32) {
    %c0_i32 = arith.constant 0 : i32
    %c0_i32_0 = arith.constant 0 : i32
    %c0_i32_1 = arith.constant 0 : i32
    return %c0_i32, %c0_i32_0 : i32, i32
  }
  func.func @transform_10(%arg0: i32, %arg1: i32) -> (i32, i32) {
    %c0_i32 = arith.constant 0 : i32
    %c0_i32_0 = arith.constant 0 : i32
    %c0_i32_1 = arith.constant 0 : i32
    return %c0_i32, %c0_i32_0 : i32, i32
  }
  func.func @transform_11(%arg0: i32, %arg1: i32) -> (i32, i32, i32) {
    %c0_i32 = arith.constant 0 : i32
    %c0_i32_0 = arith.constant 0 : i32
    %c0_i32_1 = arith.constant 0 : i32
    return %arg0, %c0_i32, %c0_i32_0 : i32, i32, i32
  }
}

</mosaic_0001>

<bundles_post_ra>
// kernel: tpu_custom_call.1
= control target key start
LH: loop header
LB: loop body
LE: loop exit
PB: predicated region body
PF: predicated region fallthrough
CT: control target
= control target key end

     0   :  { %s1566_s0 = inlined_call_operand.vmem [shape: f32[2,16,3], index: 0, kind: input, shape index: {}]   ;;  %s1567_s1 = inlined_call_operand.vmem [shape: f32[3,64], index: 1, kind: input, shape index: {}]   ;;  %s1568_s2 = inlined_call_operand.vmem [shape: bf16[64,64], index: 2, kind: input, shape index: {}]   ;;  %s1569_s3 = inlined_call_operand.hbm [shape: bf16[64,64], index: 3, kind: input, shape index: {}]   ;;  %s1570_s4 = inlined_call_operand.hbm [shape: bf16[64,128], index: 4, kind: input, shape index: {}]   ;;  %s1571_s5 = inlined_call_operand.hbm [shape: bf16[128,128], index: 5, kind: input, shape index: {}]   ;;  %s1572_s6 = inlined_call_operand.vmem [shape: f32[1,64], index: 6, kind: input, shape index: {}]   ;;  %s1573_s7 = inlined_call_operand.vmem [shape: f32[1,64], index: 7, kind: input, shape index: {}]   ;;  %s1574_s8 = inlined_call_operand.vmem [shape: f32[1,64], index: 8, kind: input, shape index: {}]   ;;  %s1575_s9 = inlined_call_operand.vmem [shape: f32[1,128], index: 9, kind: input, shape index: {}]   ;;  %s1576_s10 = inlined_call_operand.vmem [shape: f32[1,128], index: 10, kind: input, shape index: {}]   ;;  %s1577_s11 = inlined_call_operand.hbm [shape: f32[2,1,128], index: 11, kind: output, shape index: {}]  }
   0x1   :  { %1588 = sst [smem:[#allocation22_spill]] %s1570_s4 }
   0x2   :  { %16 = vsyncpa [#allocation3], 0 }
   0x3   :  { %17 = vsyncpa [#allocation6], 0 }
   0x4   :  { %18 = vsyncpa [#allocation4], 0 }
   0x5   :  { %20 = vsyncpa [#allocation4 + $0x1], 0  ;;  %s1362_s17 = smov 0   ;;  %s1364_s18 = smov 0  }
   0x6   :  { %s1366_s19 = smov 0   ;;  %s1368_s20 = smov 0  }
   0x7   :  { %s1370_s21 = smov 0   ;;  %s1372_s22 = smov 0  }
   0x8   :  { %s1374_s23 = smov 0   ;;  %s1376_s24 = smov 0  }
   0x9 LB: > { %1589 = sst [smem:[#allocation12_spill]] %s1263_s17  ;;  %s863_s25 = sadd.s32 4294967295, %s1291_s24   ;;  %s1291_s24 = sphi %s1376_s24, %s26_s24   ;;  %s1287_s23 = sphi %s1374_s23, %s1614_s23   ;;  %s1283_s22 = sphi %s1372_s22, %s1613_s22   ;;  %s1279_s21 = sphi %s1370_s21, %s1612_s21   ;;  %s1275_s20 = sphi %s1368_s20, %s1611_s20   ;;  %s1271_s19 = sphi %s1366_s19, %s1610_s19   ;;  %s1267_s18 = sphi %s1364_s18, %s1616_s18   ;;  %s1263_s17 = sphi %s1362_s17, %s1615_s17  }
   0xa   : > { %1590 = sst [smem:[#allocation13_spill]] %s1271_s19  ;;  %s864_s26 = sadd.s32 4294967294, %s1291_s24  }
   0xb   : > { %1591 = sst [smem:[#allocation14_spill]] %s1283_s22  ;;  %s35_s27 = sadd.s32 1, %s1283_s22 }
   0xc   : > { %1592 = sst [smem:[#allocation15_spill]] %s1287_s23  ;;  %s38_s28 = sadd.s32 1, %s1287_s23 }
   0xd   : > { %1593 = sst [smem:[#allocation16_spill]] %s1291_s24  ;;  %p36_p0 = scmp.ge.s32.totalorder %s35_s27, 2 }
   0xe   : > { %s283_s29 = sadd.s32 1, %s1271_s19  ;;  %p293_p1 = scmp.ne.s32.totalorder %s1271_s19, %s1267_s18 }
   0xf   : > { %p294_p2 = scmp.eq.s32.totalorder %s863_s25, 3  ;;  %s1618_s27 = smov (%p36_p0, %s35_s27), 0 }
  0x10   : > { %1594 = sst [smem:[#allocation17_spill]] %s1618_s27  ;;  %s1620_s28 = smov (!%p36_p0, %s38_s28), %s1287_s23 }
  0x11   : > { %p1412_p3 = por %p294_p2, %p293_p1  ;;  %p299_p4 = scmp.ne.s32.totalorder %s1267_s18, %s1263_s17 }
  0x12   : > { %p40_p5 = scmp.ge.s32.totalorder %s1620_s28, 2  ;;  %p300_p6 = scmp.eq.s32.totalorder %s864_s26, 3 }
  0x13   : > { %s1595_s30 = scalar_select %p1412_p3, 1, 0 }
  0x14   : > { %p865_p7 = scmp.ge.s32.totalorder %s1291_s24, 1  ;;  %p307_p8 = scmp.lt.s32.totalorder %s1291_s24, 5 }
  0x15   : > { %1596 = sst [smem:[#allocation18_spill]] %s1595_s30  ;;  %s1622_s28 = smov (%p40_p5, %s1620_s28), 0 }
  0x16   : > { %1597 = sst [smem:[#allocation19_spill]] %s1622_s28  ;;  %p1422_p9 = por %p300_p6, %p299_p4 }
  0x17   : > { %p1426_p10 = pnand %p865_p7, %p307_p8  ;;  %s280_s14 = ssub.s32 %s1287_s23, %s1622_s28 }
  0x18   : > { %s1598_s12 = scalar_select %p1422_p9, 1, 0 }
  0x19   : > { %p281_p11 = scmp.eq.s32.totalorder %s280_s14, 0  ;;  %p996_p12 = pneg %p1426_p10 }
  0x1a   : > { %1599 = sst [smem:[#allocation20_spill]] %s1598_s12  ;;  %p1434_p13 = scmp.eq.s32.totalorder %s863_s25, 0 }
  0x1b   : > { %s1439_s16 = scalar_select %p281_p11, %s1271_s19, %s283_s29  }
  0x1c   : > { %p1443_p0 = pnand %p1434_p13, %p996_p12  ;;  %s1604_s4 = sld [smem:[#allocation22_spill]] }
  0x1d   : > { %1602 = sst [smem:[#allocation21_spill]] %s1439_s16  ;;  %s1293_s28 = smov [#allocation5]  }
  0x1e   : > { %s340_s25 = sshll.u32 %s1293_s28, 4  ;;  %s1294_s23 = smov 64   ;;  %s341_s25 = int_to_ptr.vmem [resolvable:$true] %s340_s25 }
  0x1f   : > { %s1295_s12 = smov 4   ;;  %s324_s19 = sshll.u32 %s1569_s3, 4  ;;  %s325_s19 = int_to_ptr.hbm [resolvable:$true] %s324_s19 }
  0x20   : > { %s1296_s17 = smov [#allocation2]   ;;  %s1297_s28 = smov [#allocation7]  }
  0x21   : > { %s326_s24 = sshll.u32 %s1296_s17, 4  ;;  %s354_s30 = sshll.u32 %s1297_s28, 4  ;;  %s327_s24 = int_to_ptr.vmem [resolvable:$true] %s326_s24  ;;  %s355_s30 = int_to_ptr.vmem [resolvable:$true] %s354_s30 }
  0x22   : > { %s338_s14 = sshll.u32 %s1604_s4, 4  ;;  %s352_s4 = sshll.u32 %s1571_s5, 4  ;;  %s339_s14 = int_to_ptr.hbm [resolvable:$true] %s338_s14  ;;  %s353_s4 = int_to_ptr.hbm [resolvable:$true] %s352_s4 }
  0x23   : > { %1002 = dma.hbm_to_vmem [thread:$0]  (!%p1443_p0), %s339_s14, 512, %s341_s25, [#allocation6], %s1294_s23, %s1294_s23, %s1295_s12  }
  0x24   : > { %999 = dma.hbm_to_vmem [thread:$0]  (!%p1443_p0), %s325_s19, 512, %s327_s24, [#allocation3], %s1294_s23, %s1294_s23, %s1295_s12  }
  0x25   : > { %1005 = dma.hbm_to_vmem [thread:$0]  (!%p1443_p0), %s353_s4, 1024, %s355_s30, [#allocation6], %s1294_s23, %s1294_s23, %s1295_s12  }
  0x26   : > { %396 = sbr.rel (%p1426_p10) target bundleno = 752 (0x2f0), region = 64 }
  0x2b   : > { %1250 = dma.done.wait (%p1434_p13), [#allocation3], 512  }
  0x2c   : > { %1252 = vsyncadd (%p1434_p13), [#allocation3], 4294966784 }
  0x2d   : > { %1254 = dma.done.wait (%p1434_p13), [#allocation6], 1536  }
  0x2e   : > { %1256 = vsyncadd (%p1434_p13), [#allocation6], 4294965760  ;;  %s447_s4 = sand.u32 1, %s1267_s18   ;;  %p449_p1 = scmp.lt.s32.totalorder %s1279_s21, 1 }
  0x2f   : > { %p451_p2 = scmp.lt.s32.totalorder %s1275_s20, 1  ;;  %s1482_s15 = scalar_lea.vmem [#allocation8], %s447_s4 }
  0x30   : > { %s450_s17 = scalar_select %p449_p1, %s1279_s21, 1 }
  0x31   : > { %s452_s19 = scalar_select %p451_p2, %s1275_s20, 1 }
  0x32   : > { %s874_s23 = sshll.u32 %s450_s17, 1  ;;  %p876_p4 = scmp.ne.s32.totalorder %s1275_s20, 0 }
  0x33   : > { %s454_s24 = sadd.s32 %s874_s23, %s452_s19 }
  0x34   : > { %s875_s30 = sshll.u32 %s454_s24, 3  ;;  %461 = sbr.rel (%p876_p4) target bundleno = 59 (0x3b), region = 80 }
  0x35   : > { %s456_s16 = scalar_lea.vmem %s1566_s0, %s875_s30 }
  0x39   : > { %v1298_v0 = vmov 0.0  }
  0x3a   : > { %462 = vst [vmem:[%s1482_s15] sm:$0x1] %v1298_v0 }
  0x3b PF: > { %v463_v1 = vld [vmem:[%s456_s16] sm:$0xff]  ;;  %v1299_v2 = vmov 0   ;;  %v1300_v3 = vmov 2   ;;  %v1301_v4 = vmov 1   ;;  %v965_v5 = vld [vmem:[%s1568_s2 + $0x18] sm:$0xff]  ;;  %v964_v6 = vld [vmem:[%s1568_s2 + $0x10] sm:$0xff]  ;;  %s756_s28 = scalar_lea.hbm %s1577_s11, %s1279_s21 }
  0x3c   : > { %1090 = vset.pattern.permute.xlu0 %v1299_v2  ;;  %1092 = vset.pattern.permute.xlu1 %v1300_v3  ;;  %v963_v7 = vld [vmem:[%s1568_s2 + $0x8] sm:$0xff]  ;;  %v962_v8 = vld [vmem:[%s1568_s2] sm:$0xff]  ;;  %v969_v9 = vld [vmem:[#allocation2 + $0x18] sm:$0xff]  ;;  %vm529_vm0 = vcmask 523264   ;;  %s758_s17 = sshll.u32 %s1482_s15, 4  ;;  %s760_s19 = sshll.u32 %s756_s28, 4  ;;  %s759_s17 = int_to_ptr.vmem [resolvable:$true] %s758_s17  ;;  %s761_s19 = int_to_ptr.hbm [resolvable:$true] %s760_s19 }
  0x3d   : > { %467 = vperm.xlu0 %1090, %v463_v1   ;;  %480 = vperm.xlu1 %1092, %v463_v1   ;;  %v968_v10 = vld [vmem:[#allocation2 + $0x10] sm:$0xff]  ;;  %v464_v12 = vld [vmem:[%s1567_s1] sm:$0x7]  ;;  %v967_v27 = vld [vmem:[#allocation2 + $0x8] sm:$0xff]  ;;  %s748_s23 = scalar_lea.sflag [#allocation4], %s447_s4  ;;  %s1203_s24 = sshra.s32 %s761_s19, 4  ;;  %s1204_s24 = int_to_ptr.hbm [resolvable:$true] %s1203_s24 }
  0x3e   : > { %537 = vmatpush.bf16.msra.mxu0 %v965_v5  ;;  %591 = vmatpush.bf16.msra.mxu1 %v969_v9  ;;  %v470_v13 = vperm.slane %v464_v12, 0  ;;  %v476_v14 = vperm.slane %v464_v12, 1  ;;  %v483_v15 = vperm.slane %v464_v12, 2  ;;  %v1094_v22 = vld [vmem:[%s1572_s6] ss:$0 sm:$0xff]  ;;  %v973_v29 = vld [vmem:[#allocation5 + $0x18] sm:$0xff]  ;;  %p1210_p8 = scmp.lt.s32.totalorder %s1204_s24, %s1577_s11 }
  0x3f   : > { %v966_v28 = vld [vmem:[#allocation2] sm:$0xff]  ;;  %645 = vmatpush.bf16.msra.mxu2 %v973_v29  ;;  %v972_v30 = vld [vmem:[#allocation5 + $0x10] sm:$0xff]  ;;  %v971_v37 = vld [vmem:[#allocation5 + $0x8] sm:$0xff]  ;;  %s1205_s30 = scalar_lea.hbm %s1204_s24, 1  ;;  %s1209_s13 = scalar_lea.hbm %s1577_s11, 2 }
  0x40   : > { %v1095_v31 = vld [vmem:[%s1573_s7] ss:$0 sm:$0xff]  ;;  %v981_v39 = vld [vmem:[#allocation7 + $0x38] sm:$0xff]  ;;  %v980_v40 = vld [vmem:[#allocation7 + $0x30] sm:$0xff]  ;;  %p1206_p5 = scmp.ne.s32.totalorder %s1204_s24, %s1205_s30  ;;  %p1211_p10 = scmp.lt.s32.totalorder %s1209_s13, %s1205_s30 }
  0x41   : > { %v970_v38 = vld [vmem:[#allocation5] sm:$0xff]  ;;  %724 = vmatpush.bf16.msra.mxu3 %v981_v39  ;;  %v979_v41 = vld [vmem:[#allocation7 + $0x28] sm:$0xff]  ;;  %v977_v43 = vld [vmem:[#allocation7 + $0x18] sm:$0xff] }
  0x42   : > { %538 = vmatpush.bf16.msra.mxu0 %v964_v6  ;;  %592 = vmatpush.bf16.msra.mxu1 %v968_v10  ;;  %v978_v42 = vld [vmem:[#allocation7 + $0x20] sm:$0xff]  ;;  %v976_v44 = vld [vmem:[#allocation7 + $0x10] sm:$0xff]  ;;  %v975_v51 = vld [vmem:[#allocation7 + $0x8] sm:$0xff]  ;;  %p1207_p6 = pnand %p1206_p5, %p1412_p3  ;;  %p1212_p11 = por %p1211_p10, %p1210_p8 }
  0x43   : > { %646 = vmatpush.bf16.msra.mxu2 %v972_v30  ;;  %v1096_v45 = vld [vmem:[%s1574_s8] ss:$0 sm:$0xff] }
  0x44   : > { %v974_v52 = vld [vmem:[#allocation7] sm:$0xff]  ;;  %p1208_p7 = pneg %p1207_p6 }
  0x45   : > { %1091 = vset.pattern.permute.xlu0 %v1301_v4  ;;  %725 = vmatpush.bf16.msra.mxu3 %v980_v40  ;;  %v1097_v53 = vld [vmem:[%s1575_s9] ss:$0 sm:$0xff] }
  0x46   : > { %473 = vperm.xlu0 %1091, %v463_v1   ;;  %539 = vmatpush.bf16.msra.mxu0 %v963_v7  ;;  %v1098_v59 = vld [vmem:[%s1576_s10] ss:$0 sm:$0xff]  ;;  %p1213_p12 = pnand %p1212_p11, %p1208_p7 }
  0x47   : > { %593 = vmatpush.bf16.msra.mxu1 %v967_v27  ;;  %647 = vmatpush.bf16.msra.mxu2 %v971_v37  ;;  %v738_v5 = vld [vmem:[%s1482_s15] sm:$0x1] }
  0x49   : > { %726 = vmatpush.bf16.msra.mxu3 %v979_v41 }
  0x4a   : > { %540 = vmatpush.bf16.msra.mxu0 %v962_v8 }
  0x4b   : > { %594 = vmatpush.bf16.msra.mxu1 %v966_v28  ;;  %648 = vmatpush.bf16.msra.mxu2 %v970_v38 }
  0x4d   : > { %727 = vmatpush.bf16.msra.mxu3 %v978_v42 }
  0x4e   : > { %1093 = vset.pattern.permute.xlu0 %v1300_v3 }
  0x51   : > { %728 = vmatpush.bf16.msra.mxu3 %v977_v43 }
  0x55   : > { %729 = vmatpush.bf16.msra.mxu3 %v976_v44 }
  0x59   : > { %730 = vmatpush.bf16.msra.mxu3 %v975_v51 }
  0x5d   : > { %731 = vmatpush.bf16.msra.mxu3 %v974_v52 }
  0xaf   : > { %v468_v11 = vpop.permute.xlu0 %467  ;;  %v481_v16 = vpop.permute.xlu1 %480 }
  0xb0   : > { %v471_v18 = vmul.f32 %v470_v13, %v468_v11  ;;  %v484_v20 = vmul.f32 %v483_v15, %v481_v16 }
  0xb8   : > { %v474_v17 = vpop.permute.xlu0 %473 }
  0xb9   : > { %v477_v19 = vmul.f32 %v476_v14, %v474_v17 }
  0xbb   : > { %v478_v21 = vadd.f32 %v477_v19, %v471_v18 }
  0xbd   : > { %v485_v23 = vadd.f32 %v484_v20, %v478_v21 }
  0xbf   : > { %v490_v24 = vadd.f32 %v1094_v22, %v485_v23 }
  0xc1   : > { %v491_v25 = vmax.f32 %v490_v24, 0.0 }
  0xc3   : > { %v492_v26 = vpack.c.bf16 %v491_v25, %v491_v25 }
  0xc5   : > { %893 = vmatmul.msk.bf16.vlgmr.msra.gmra.mxu0 %vm529_vm0, %v492_v26 }
 0x142   : > { %v542_v32 = vpop.f32.mrf.mxu0 }
 0x143   : > { %v543_v33 = vadd.f32 %v1095_v31, %v542_v32 }
 0x145   : > { %v546_v34 = vmax.f32 %v543_v33, 0.0 }
 0x147   : > { %v547_v35 = vpack.c.bf16 %v546_v34, %v546_v34 }
 0x149   : > { %910 = vmatmul.msk.bf16.vlgmr.msra.gmra.mxu1 %vm529_vm0, %v547_v35 }
 0x14a   : > { %v544_v36 = vpop.f32.mrf.mxu0 }
 0x1c6   : > { %v596_v46 = vpop.f32.mrf.mxu1 }
 0x1c7   : > { %v597_v47 = vadd.f32 %v1096_v45, %v596_v46 }
 0x1c9   : > { %v600_v48 = vmax.f32 %v597_v47, 0.0 }
 0x1cb   : > { %v601_v49 = vpack.c.bf16 %v600_v48, %v600_v48 }
 0x1cd   : > { %927 = vmatmul.msk.bf16.vlgmr.msra.gmra.mxu2 %vm529_vm0, %v601_v49 }
 0x1ce   : > { %v598_v50 = vpop.f32.mrf.mxu1 }
 0x250   : > { %v650_v54 = vpop.f32.mrf.mxu2 }
 0x251   : > { %v651_v55 = vadd.f32 %v1097_v53, %v650_v54 }
 0x253   : > { %v654_v56 = vmax.f32 %v651_v55, 0.0 }
 0x255   : > { %v655_v57 = vpack.c.bf16 %v654_v56, %v654_v56 }
 0x257   : > { %732 = vmatmul.bf16.vlgmr.msra.gmra.mxu3 %v655_v57 }
 0x258   : > { %v652_v58 = vpop.f32.mrf.mxu2 }
 0x2da   : > { %v733_v60 = vpop.f32.mrf.mxu3 }
 0x2db   : > { %v734_v61 = vadd.f32 %v1098_v59, %v733_v60 }
 0x2dd   : > { %v737_v62 = vmax.f32 %v734_v61, 0.0 }
 0x2df   : > { %v739_v63 = vrot.slane %v737_v62, 4 }
 0x2e1   : > { %v740_v0 = vmax.f32 %v737_v62, %v739_v63 }
 0x2e2   : > { %v735_v1 = vpop.f32.mrf.mxu3 }
 0x2e3   : > { %v741_v2 = vrot.slane %v740_v0, 2 }
 0x2e5   : > { %v742_v3 = vmax.f32 %v740_v0, %v741_v2 }
 0x2e7   : > { %v743_v4 = vrot.slane %v742_v3, 1 }
 0x2e9   : > { %v744_v6 = vmax.f32 %v742_v3, %v743_v4 }
 0x2eb   : > { %v745_v7 = vmax.f32 %v738_v5, %v744_v6 }
 0x2ed   : > { %746 = vst [vmem:[%s1482_s15] sm:$0x1] %v745_v7 }
 0x2ee   : > { %1216 = shalt.err (!%p1213_p12)
}
 0x2ef   : > { %994 = dma.vmem_to_hbm [thread:$0]  (%p1412_p3), %s759_s17, 16, %s761_s19, %s748_s23  }
 0x2f0 PF: > { %s1606_s4 = sld [smem:[#allocation16_spill]] }
 0x2f1   : > { %s1607_s15 = sld [smem:[#allocation12_spill]] }
 0x2f6   : > { %p1016_p13 = scmp.ge.s32.totalorder %s1606_s4, 2 }
 0x2f7   : > { %s772_s20 = sand.u32 1, %s1607_s15  }
 0x2f8   : > { %p1007_p0 = pnand %p1016_p13, %p1422_p9  ;;  %s773_s25 = scalar_lea.sflag [#allocation4], %s772_s20 }
 0x2fa   : > { %p1008_p1 = pneg %p1007_p0 }
 0x2fc   : > { %1258 = dma.done.wait (%p1008_p1), %s773_s25, 16  }
 0x2fd   : > { %1260 = vsyncadd (%p1008_p1), %s773_s25, 4294967280  ;;  %s26_s24 = sadd.s32 1, %s1606_s4   ;;  %s1609_s29 = sld [smem:[#allocation13_spill]] }
 0x2fe   : > { %p23_p2 = scmp.ge.s32.totalorder %s26_s24, 6   ;;  %s1610_s19 = sld [smem:[#allocation21_spill]] }
 0x2ff   : > { %s1611_s20 = sld [smem:[#allocation14_spill]]  ;;  %s1615_s17 = smov %s1267_s18 }
 0x300   : > { %s1612_s21 = sld [smem:[#allocation15_spill]]  ;;  %25 = sbr.rel (!%p23_p2) target bundleno = 9 (0x9), region = 116 }
 0x301   : > { %s1613_s22 = sld [smem:[#allocation17_spill]] }
 0x302   : > { %s1614_s23 = sld [smem:[#allocation19_spill]] }
 0x303   : > { %s1616_s18 = smov %s1609_s29 }
 0x305   :  { %778 = vsyncpa [#allocation3], 1 }
 0x306   :  { %780 = vsyncpa [#allocation3 + $0x1], 1 }
 0x307   :  { %781 = vsyncpa [#allocation6], 1 }
 0x308   :  { %782 = vsyncpa [#allocation4], 1 }
 0x309   :  { %784 = vsyncpa [#allocation4 + $0x1], 1 }

</bundles_post_ra>
